<compile_context>
chip_gen: v5e
topology: v5e:2x2
jax: 0.10.0
libtpu: 0.0.40
codegen_flags: <defaults>
</compile_context>

<pallas_src>
import numpy as np
import jax
import jax.numpy as jnp
from jax.experimental import pallas as pl
from jax.experimental.pallas import tpu as pltpu

HIDDEN = 256
WEIGHT_DTYPE = jnp.bfloat16   # bf16 halves weight DMA; jnp.float32 for exact f32 semantics


# ---------------------------------- kernel ----------------------------------

def _model_kernel(x_ref, w1t_ref, b1_ref, wfct_ref, bfc_ref, wheadt_ref, bhead_ref,
                  comb_ref, seg_ref, out_ref):
    f32 = jnp.float32
    x = x_ref[...]                                                    # (TB, S)

    # fc1 + relu
    h = jnp.maximum(
        jnp.dot(x, w1t_ref[...].astype(f32), preferred_element_type=f32) + b1_ref[...],
        0.0)                                                          # (TB, 256)

    # fused [adv_fc | value_fc] noisy layers + relu (one wide matmul)
    hv = jnp.maximum(
        jnp.dot(h, wfct_ref[...].astype(f32), preferred_element_type=f32) + bfc_ref[...],
        0.0)                                                          # (TB, 512)

    # fused block-diagonal heads -> [adv | value]
    head = (jnp.dot(hv, wheadt_ref[...].astype(f32), preferred_element_type=f32)
            + bhead_ref[...])                                         # (TB, A*Z + Z)

    # dueling combine: adv - adv.mean(actions) + broadcast(val), one small matmul
    logits = jnp.dot(head, comb_ref[...], preferred_element_type=f32)  # (TB, A*Z)

    # per-action softmax over atoms, vectorized over the whole (TB, A*Z) block.
    # A single row-wide max is a valid stabilizer (constant shift per row).
    m = jnp.max(logits, axis=-1, keepdims=True)
    e = jnp.exp(logits - m)
    denom = jnp.dot(e, seg_ref[...], preferred_element_type=f32)       # per-action segment sums
    p = e * pl.reciprocal(denom, approx=False)
    out_ref[...] = jnp.maximum(p, 0.001)                               # single lane-dense store


def _combine_matrices(n_actions, n_atoms):
    """Compile-time constant matrices for the vectorized dueling/softmax epilogue."""
    A, Z = n_actions, n_atoms
    AZ = A * Z
    eye_z = np.eye(Z, dtype=np.float32)
    mean_mat = np.kron(np.full((A, A), 1.0 / A, dtype=np.float32), eye_z)   # (AZ, AZ)
    adv_part = np.eye(AZ, dtype=np.float32) - mean_mat                      # adv - mean(adv)
    val_part = np.tile(eye_z, (1, A))                                       # (Z, AZ) broadcast val
    combine = np.concatenate([adv_part, val_part], axis=0)                  # (AZ + Z, AZ)
    seg_sum = np.kron(np.eye(A, dtype=np.float32), np.ones((Z, Z), np.float32))  # (AZ, AZ)
    return jnp.asarray(combine), jnp.asarray(seg_sum)


def model_forward(x, packed, n_actions, n_atoms):
    B, S = x.shape
    AZ = n_actions * n_atoms

    # Batch tile: multiple of 8 sublanes; cap at 128 rows so large batches
    # pipeline across the grid (and across both TensorCores on v7x).
    TB = 128 if B > 128 else -(-B // 8) * 8
    B_pad = -(-B // TB) * TB
    if B_pad != B:
        x = jnp.pad(x, ((0, B_pad - B), (0, 0)))

    w1t, b1, wfct, bfc, wheadt, bhead = packed
    comb, seg = _combine_matrices(n_actions, n_atoms)

    def resident(a):  # weights / constants stay at block (0, 0) for every grid step
        return pl.BlockSpec(a.shape, lambda i: (0, 0))

    out2d = pl.pallas_call(
        _model_kernel,
        out_shape=jax.ShapeDtypeStruct((B_pad, AZ), jnp.float32),
        grid_spec=pltpu.PrefetchScalarGridSpec(
            num_scalar_prefetch=0,
            grid=(B_pad // TB,),
            in_specs=[
                pl.BlockSpec((TB, S), lambda i: (i, 0)),
                resident(w1t), resident(b1),
                resident(wfct), resident(bfc),
                resident(wheadt), resident(bhead),
                resident(comb), resident(seg),
            ],
            out_specs=pl.BlockSpec((TB, AZ), lambda i: (i, 0)),
        ),
        compiler_params=pltpu.CompilerParams(
            dimension_semantics=("parallel",)),
    )(x, w1t, b1, wfct, bfc, wheadt, bhead, comb, seg)
    return out2d[:B].reshape(B, n_actions, n_atoms)


# -------------------- parameter construction (init-time glue) --------------------

def _f(x):
    return jnp.sign(x) * jnp.sqrt(jnp.abs(x))


def make_noisy_layer(key, n_in, n_out):
    """Effective (W, b_row) with the factorized noise already folded in."""
    k1, k2, k3, k4 = jax.random.split(key, 4)
    bound = 1.0 / np.sqrt(n_in)
    mu_w = jax.random.uniform(k1, (n_out, n_in), jnp.float32, -bound, bound)
    sigma_w = jnp.full((n_out, n_in), 0.5 / np.sqrt(n_in), jnp.float32)
    mu_b = jax.random.uniform(k2, (n_out, 1), jnp.float32, -bound, bound)
    sigma_b = jnp.full((n_out, 1), 0.5 / np.sqrt(n_out), jnp.float32)
    eps_i = _f(jax.random.normal(k3, (n_in, 1), jnp.float32))
    eps_j = _f(jax.random.normal(k4, (n_out, 1), jnp.float32))
    W = mu_w + sigma_w * (eps_j @ eps_i.T)            # (n_out, n_in)
    b = mu_b + sigma_b * eps_j                        # (n_out, 1)
    return W, b.reshape(1, n_out)


def make_params(key, n_states, n_actions, n_atoms):
    ks = jax.random.split(key, 5)
    W1 = jax.random.normal(ks[0], (HIDDEN, n_states), jnp.float32) * np.sqrt(2.0 / n_states)
    b1 = jnp.zeros((1, HIDDEN), jnp.float32)
    Wafc, bafc = make_noisy_layer(ks[1], HIDDEN, HIDDEN)
    Wvfc, bvfc = make_noisy_layer(ks[2], HIDDEN, HIDDEN)
    Wa, ba = make_noisy_layer(ks[3], HIDDEN, n_actions * n_atoms)
    Wv, bv = make_noisy_layer(ks[4], HIDDEN, n_atoms)
    return dict(W1=W1, b1=b1, Wafc=Wafc, bafc=bafc, Wvfc=Wvfc, bvfc=bvfc,
                Wa=Wa, ba=ba, Wv=Wv, bv=bv)


def pack_params(p, n_actions, n_atoms):
    """Wrapper-side weight packing: transpose, fuse twin layers, block-diag heads."""
    AZ, Z = n_actions * n_atoms, n_atoms
    w1t = p["W1"].T                                                   # (S, 256), keep f32 (tiny)
    b1 = p["b1"]
    wfct = jnp.concatenate([p["Wafc"].T, p["Wvfc"].T], axis=1).astype(WEIGHT_DTYPE)   # (256, 512)
    bfc = jnp.concatenate([p["bafc"], p["bvfc"]], axis=1)                             # (1, 512)
    wheadt = jnp.zeros((2 * HIDDEN, AZ + Z), jnp.float32)
    wheadt = wheadt.at[:HIDDEN, :AZ].set(p["Wa"].T)
    wheadt = wheadt.at[HIDDEN:, AZ:].set(p["Wv"].T)
    wheadt = wheadt.astype(WEIGHT_DTYPE)                                              # (512, AZ+Z)
    bhead = jnp.concatenate([p["ba"], p["bv"]], axis=1)                               # (1, AZ+Z)
    return [w1t, b1, wfct, bfc, wheadt, bhead]


def quantize_like_kernel(p):
    """Apply the same weight quantization the kernel sees, so the check is tight."""
    q = dict(p)
    for k in ("Wafc", "Wvfc", "Wa", "Wv"):
        q[k] = p[k].astype(WEIGHT_DTYPE).astype(jnp.float32)
    return q


def reference_forward(x, p, n_actions, n_atoms):
    h = jax.nn.relu(x @ p["W1"].T + p["b1"])
    a1 = jax.nn.relu(h @ p["Wafc"].T + p["bafc"])
    v1 = jax.nn.relu(h @ p["Wvfc"].T + p["bvfc"])
    adv = (a1 @ p["Wa"].T + p["ba"]).reshape(-1, n_actions, n_atoms)
    val = (v1 @ p["Wv"].T + p["bv"]).reshape(-1, 1, n_atoms)
    mass = val + adv - adv.mean(axis=1, keepdims=True)
    return jnp.clip(jax.nn.softmax(mass, axis=-1), 0.001, None)


if __name__ == "__main__":
    n_states, n_actions, n_atoms, batch = 8, 4, 8, 2

    key = jax.random.PRNGKey(0)
    k_p, k_x = jax.random.split(key)
    params = make_params(k_p, n_states, n_actions, n_atoms)
    x = jax.random.normal(k_x, (batch, n_states), jnp.float32)

    packed = pack_params(params, n_actions, n_atoms)
    out = model_forward(x, packed, n_actions, n_atoms)
    out = jax.block_until_ready(out)

    ref = reference_forward(x, quantize_like_kernel(params), n_actions, n_atoms)
    np.testing.assert_allclose(np.asarray(out), np.asarray(ref), rtol=1e-4, atol=1e-5)

    assert out.shape == (batch, n_actions, n_atoms)
    print("KERNEL_OK")
</pallas_src>

<mosaic_0001>
module attributes {stable_mosaic.version = 11 : i64} {
  func.func @_model_kernel(%arg0: i32, %arg1: memref<8x8xf32, #tpu.memory_space<vmem>>, %arg2: memref<8x256xf32, #tpu.memory_space<vmem>>, %arg3: memref<1x256xf32, #tpu.memory_space<vmem>>, %arg4: memref<256x512xbf16, #tpu.memory_space<vmem>>, %arg5: memref<1x512xf32, #tpu.memory_space<vmem>>, %arg6: memref<512x40xbf16, #tpu.memory_space<vmem>>, %arg7: memref<1x40xf32, #tpu.memory_space<vmem>>, %arg8: memref<40x32xf32, #tpu.memory_space<vmem>>, %arg9: memref<32x32xf32, #tpu.memory_space<vmem>>, %arg10: memref<8x32xf32, #tpu.memory_space<vmem>>) attributes {dimension_semantics = [#tpu.dimension_semantics<parallel>], iteration_bounds = array<i64: 1>, scalar_prefetch = 0 : i64, scratch_operands = 0 : i64, tpu.core_type = #tpu.core_type<tc>, window_params = [{transform_indices = @transform_0, window_bounds = array<i64: 8, 8>}, {pipeline_mode = #tpu.pipeline_mode<synchronous>, transform_indices = @transform_1, window_bounds = array<i64: 8, 256>}, {pipeline_mode = #tpu.pipeline_mode<synchronous>, transform_indices = @transform_2, window_bounds = array<i64: 1, 256>}, {pipeline_mode = #tpu.pipeline_mode<synchronous>, transform_indices = @transform_3, window_bounds = array<i64: 256, 512>}, {pipeline_mode = #tpu.pipeline_mode<synchronous>, transform_indices = @transform_4, window_bounds = array<i64: 1, 512>}, {pipeline_mode = #tpu.pipeline_mode<synchronous>, transform_indices = @transform_5, window_bounds = array<i64: 512, 40>}, {pipeline_mode = #tpu.pipeline_mode<synchronous>, transform_indices = @transform_6, window_bounds = array<i64: 1, 40>}, {pipeline_mode = #tpu.pipeline_mode<synchronous>, transform_indices = @transform_7, window_bounds = array<i64: 40, 32>}, {pipeline_mode = #tpu.pipeline_mode<synchronous>, transform_indices = @transform_8, window_bounds = array<i64: 32, 32>}, {transform_indices = @transform_9, window_bounds = array<i64: 8, 32>}]} {
    %c0 = arith.constant 0 : index
    %c0_0 = arith.constant 0 : index
    %0 = vector.load %arg1[%c0, %c0_0] : memref<8x8xf32, #tpu.memory_space<vmem>>, vector<8x8xf32>
    %c0_1 = arith.constant 0 : index
    %c0_2 = arith.constant 0 : index
    %1 = vector.load %arg2[%c0_1, %c0_2] : memref<8x256xf32, #tpu.memory_space<vmem>>, vector<8x256xf32>
    %cst = arith.constant dense<0.000000e+00> : vector<8x256xf32>
    %2 = tpu.matmul %0, %1, %cst {dimension_numbers = #tpu.dot_dimension_numbers<[1], [0], [0], [1], [0, 0, 1, 1], [], []>} : vector<8x8xf32>, vector<8x256xf32>, vector<8x256xf32> -> vector<8x256xf32>
    %c0_3 = arith.constant 0 : index
    %c0_4 = arith.constant 0 : index
    %3 = vector.load %arg3[%c0_3, %c0_4] : memref<1x256xf32, #tpu.memory_space<vmem>>, vector<1x256xf32>
    %4 = vector.broadcast %3 : vector<1x256xf32> to vector<8x256xf32>
    %5 = arith.addf %2, %4 : vector<8x256xf32>
    %cst_5 = arith.constant 0.000000e+00 : f32
    %6 = vector.broadcast %cst_5 : f32 to vector<8x256xf32>
    %7 = arith.maximumf %5, %6 : vector<8x256xf32>
    %c0_6 = arith.constant 0 : index
    %c0_7 = arith.constant 0 : index
    %8 = vector.load %arg4[%c0_6, %c0_7] : memref<256x512xbf16, #tpu.memory_space<vmem>>, vector<256x512xbf16>
    %9 = arith.extf %8 : vector<256x512xbf16> to vector<256x512xf32>
    %cst_8 = arith.constant dense<0.000000e+00> : vector<8x512xf32>
    %10 = tpu.matmul %7, %9, %cst_8 {dimension_numbers = #tpu.dot_dimension_numbers<[1], [0], [0], [1], [0, 0, 1, 1], [], []>} : vector<8x256xf32>, vector<256x512xf32>, vector<8x512xf32> -> vector<8x512xf32>
    %c0_9 = arith.constant 0 : index
    %c0_10 = arith.constant 0 : index
    %11 = vector.load %arg5[%c0_9, %c0_10] : memref<1x512xf32, #tpu.memory_space<vmem>>, vector<1x512xf32>
    %12 = vector.broadcast %11 : vector<1x512xf32> to vector<8x512xf32>
    %13 = arith.addf %10, %12 : vector<8x512xf32>
    %cst_11 = arith.constant 0.000000e+00 : f32
    %14 = vector.broadcast %cst_11 : f32 to vector<8x512xf32>
    %15 = arith.maximumf %13, %14 : vector<8x512xf32>
    %c0_12 = arith.constant 0 : index
    %c0_13 = arith.constant 0 : index
    %16 = vector.load %arg6[%c0_12, %c0_13] : memref<512x40xbf16, #tpu.memory_space<vmem>>, vector<512x40xbf16>
    %17 = arith.extf %16 : vector<512x40xbf16> to vector<512x40xf32>
    %cst_14 = arith.constant dense<0.000000e+00> : vector<8x40xf32>
    %18 = tpu.matmul %15, %17, %cst_14 {dimension_numbers = #tpu.dot_dimension_numbers<[1], [0], [0], [1], [0, 0, 1, 1], [], []>} : vector<8x512xf32>, vector<512x40xf32>, vector<8x40xf32> -> vector<8x40xf32>
    %c0_15 = arith.constant 0 : index
    %c0_16 = arith.constant 0 : index
    %19 = vector.load %arg7[%c0_15, %c0_16] : memref<1x40xf32, #tpu.memory_space<vmem>>, vector<1x40xf32>
    %20 = vector.broadcast %19 : vector<1x40xf32> to vector<8x40xf32>
    %21 = arith.addf %18, %20 : vector<8x40xf32>
    %c0_17 = arith.constant 0 : index
    %c0_18 = arith.constant 0 : index
    %22 = vector.load %arg8[%c0_17, %c0_18] : memref<40x32xf32, #tpu.memory_space<vmem>>, vector<40x32xf32>
    %cst_19 = arith.constant dense<0.000000e+00> : vector<8x32xf32>
    %23 = tpu.matmul %21, %22, %cst_19 {dimension_numbers = #tpu.dot_dimension_numbers<[1], [0], [0], [1], [0, 0, 1, 1], [], []>} : vector<8x40xf32>, vector<40x32xf32>, vector<8x32xf32> -> vector<8x32xf32>
    %cst_20 = arith.constant dense<0xFF800000> : vector<8xf32>
    %24 = vector.multi_reduction <maximumf>, %23, %cst_20 [1] : vector<8x32xf32> to vector<8xf32>
    %25 = vector.shape_cast %24 : vector<8xf32> to vector<8x1xf32>
    %26 = vector.broadcast %25 : vector<8x1xf32> to vector<8x32xf32>
    %27 = arith.subf %23, %26 : vector<8x32xf32>
    %28 = math.exp %27 : vector<8x32xf32>
    %c0_21 = arith.constant 0 : index
    %c0_22 = arith.constant 0 : index
    %29 = vector.load %arg9[%c0_21, %c0_22] : memref<32x32xf32, #tpu.memory_space<vmem>>, vector<32x32xf32>
    %cst_23 = arith.constant dense<0.000000e+00> : vector<8x32xf32>
    %30 = tpu.matmul %28, %29, %cst_23 {dimension_numbers = #tpu.dot_dimension_numbers<[1], [0], [0], [1], [0, 0, 1, 1], [], []>} : vector<8x32xf32>, vector<32x32xf32>, vector<8x32xf32> -> vector<8x32xf32>
    %31 = tpu.reciprocal %30 : vector<8x32xf32> -> vector<8x32xf32>
    %32 = arith.mulf %28, %31 : vector<8x32xf32>
    %cst_24 = arith.constant 1.000000e-03 : f32
    %33 = vector.broadcast %cst_24 : f32 to vector<8x32xf32>
    %34 = arith.maximumf %32, %33 : vector<8x32xf32>
    %c0_25 = arith.constant 0 : index
    %c0_26 = arith.constant 0 : index
    %35 = vector.load %arg10[%c0_25, %c0_26] : memref<8x32xf32, #tpu.memory_space<vmem>>, vector<8x32xf32>
    tpu.vector_store %arg10[%c0_25, %c0_26], %34 {strides = array<i32>} : memref<8x32xf32, #tpu.memory_space<vmem>>, vector<8x32xf32>,
    return
  }
  func.func @transform_0(%arg0: i32) -> (i32, i32) {
    %c0_i32 = arith.constant 0 : i32
    %c0_i32_0 = arith.constant 0 : i32
    return %arg0, %c0_i32 : i32, i32
  }
  func.func @transform_1(%arg0: i32) -> (i32, i32) {
    %c0_i32 = arith.constant 0 : i32
    %c0_i32_0 = arith.constant 0 : i32
    %c0_i32_1 = arith.constant 0 : i32
    return %c0_i32, %c0_i32_0 : i32, i32
  }
  func.func @transform_2(%arg0: i32) -> (i32, i32) {
    %c0_i32 = arith.constant 0 : i32
    %c0_i32_0 = arith.constant 0 : i32
    %c0_i32_1 = arith.constant 0 : i32
    return %c0_i32, %c0_i32_0 : i32, i32
  }
  func.func @transform_3(%arg0: i32) -> (i32, i32) {
    %c0_i32 = arith.constant 0 : i32
    %c0_i32_0 = arith.constant 0 : i32
    %c0_i32_1 = arith.constant 0 : i32
    return %c0_i32, %c0_i32_0 : i32, i32
  }
  func.func @transform_4(%arg0: i32) -> (i32, i32) {
    %c0_i32 = arith.constant 0 : i32
    %c0_i32_0 = arith.constant 0 : i32
    %c0_i32_1 = arith.constant 0 : i32
    return %c0_i32, %c0_i32_0 : i32, i32
  }
  func.func @transform_5(%arg0: i32) -> (i32, i32) {
    %c0_i32 = arith.constant 0 : i32
    %c0_i32_0 = arith.constant 0 : i32
    %c0_i32_1 = arith.constant 0 : i32
    return %c0_i32, %c0_i32_0 : i32, i32
  }
  func.func @transform_6(%arg0: i32) -> (i32, i32) {
    %c0_i32 = arith.constant 0 : i32
    %c0_i32_0 = arith.constant 0 : i32
    %c0_i32_1 = arith.constant 0 : i32
    return %c0_i32, %c0_i32_0 : i32, i32
  }
  func.func @transform_7(%arg0: i32) -> (i32, i32) {
    %c0_i32 = arith.constant 0 : i32
    %c0_i32_0 = arith.constant 0 : i32
    %c0_i32_1 = arith.constant 0 : i32
    return %c0_i32, %c0_i32_0 : i32, i32
  }
  func.func @transform_8(%arg0: i32) -> (i32, i32) {
    %c0_i32 = arith.constant 0 : i32
    %c0_i32_0 = arith.constant 0 : i32
    %c0_i32_1 = arith.constant 0 : i32
    return %c0_i32, %c0_i32_0 : i32, i32
  }
  func.func @transform_9(%arg0: i32) -> (i32, i32) {
    %c0_i32 = arith.constant 0 : i32
    %c0_i32_0 = arith.constant 0 : i32
    return %arg0, %c0_i32 : i32, i32
  }
}

</mosaic_0001>

<bundles_post_ra>
// kernel: tpu_custom_call.1
= control target key start
LH: loop header
LB: loop body
LE: loop exit
PB: predicated region body
PF: predicated region fallthrough
CT: control target
= control target key end

     0   :  { %14 = vsyncpa [#allocation3], 0  ;;  %s1211_s0 = inlined_call_operand.vmem [shape: f32[8,8], index: 0, kind: input, shape index: {}]   ;;  %s1212_s1 = inlined_call_operand.vmem [shape: f32[8,256], index: 1, kind: input, shape index: {}]   ;;  %s1213_s2 = inlined_call_operand.vmem [shape: f32[1,256], index: 2, kind: input, shape index: {}]   ;;  %s1214_s3 = inlined_call_operand.hbm [shape: bf16[256,512], index: 3, kind: input, shape index: {}]   ;;  %s1215_s4 = inlined_call_operand.vmem [shape: f32[1,512], index: 4, kind: input, shape index: {}]   ;;  %s1216_s5 = inlined_call_operand.vmem [shape: bf16[512,40], index: 5, kind: input, shape index: {}]   ;;  %s1217_s6 = inlined_call_operand.vmem [shape: f32[1,40], index: 6, kind: input, shape index: {}]   ;;  %s1218_s7 = inlined_call_operand.vmem [shape: f32[40,32], index: 7, kind: input, shape index: {}]   ;;  %s1219_s8 = inlined_call_operand.vmem [shape: f32[32,32], index: 8, kind: input, shape index: {}]   ;;  %s1220_s9 = inlined_call_operand.hbm [shape: f32[8,32], index: 9, kind: output, shape index: {}]  }
   0x1   :  { %15 = vsyncpa [#allocation4], 0  ;;  %s26_s11 = sshll.u32 %s1214_s3, 4  ;;  %s1003_s12 = smov [#allocation2]   ;;  %s27_s11 = int_to_ptr.hbm [resolvable:$true] %s26_s11 }
   0x2   :  { %s28_s13 = sshll.u32 %s1003_s12, 4  ;;  %s1004_s14 = smov 256   ;;  %s29_s13 = int_to_ptr.vmem [resolvable:$true] %s28_s13 }
   0x3   :  { %s1005_s15 = smov 16  }
   0x4   :  { %34 = dma.hbm_to_vmem [thread:$0]  %s27_s11, 8192, %s29_s13, [#allocation3], %s1004_s14, %s1004_s14, %s1005_s15  }
   0x5   :  { %999 = dma.done.wait [#allocation3], 8192  }
   0x6   :  { %1000 = vsyncadd [#allocation3], 4294959104  ;;  %vm58_vm0 = vcmask 64512   ;;  %v50_v0 = vld [vmem:[%s1212_s1] sm:$0xff]  ;;  %v51_v1 = vld [vmem:[%s1212_s1 + $0x8] sm:$0xff]  ;;  %vm687_vm1 = vcmask 326656  }
   0x7   :  { %v49_v2 = vld [vmem:[%s1211_s0] sm:$0xff]  ;;  %77 = vmatpush.msra.mxu0 %v50_v0  ;;  %97 = vmatpush.msra.mxu1 %v51_v1  ;;  %v134_v3 = vld [vmem:[#allocation2 + $0xf0] sm:$0xff]  ;;  %vm711_vm2 = vcmask 261120   ;;  %s769_s30 = sshll.u32 %s1220_s9, 4  ;;  %s770_s30 = int_to_ptr.hbm [resolvable:$true] %s769_s30 }
   0x8   :  { %v166_v4 = vld [vmem:[#allocation2 + $0x1f0] sm:$0xff]  ;;  %v132_v5 = vld [vmem:[#allocation2 + $0xe0] sm:$0xff]  ;;  %779 = vmatmul.msk.f32.vlgmr.msra.gmra.mxu0 %vm58_vm0, %v49_v2  ;;  %780 = vmatmul.msk.f32.vlgmr.msra.gmra.mxu1 %vm58_vm0, %v49_v2  ;;  %v228_v6 = vunpack.c.l.bf16 %v134_v3  ;;  %v229_v8 = vunpack.c.h.bf16 %v134_v3 }
   0x9   :  { %v292_v7 = vunpack.c.l.bf16 %v166_v4  ;;  %v293_v9 = vunpack.c.h.bf16 %v166_v4  ;;  %v164_v10 = vld [vmem:[#allocation2 + $0x1e0] sm:$0xff]  ;;  %v130_v11 = vld [vmem:[#allocation2 + $0xd0] sm:$0xff]  ;;  %v224_v13 = vunpack.c.l.bf16 %v132_v5  ;;  %v225_v15 = vunpack.c.h.bf16 %v132_v5 }
   0xa   :  { %v162_v12 = vld [vmem:[#allocation2 + $0x1d0] sm:$0xff]  ;;  %v288_v14 = vunpack.c.l.bf16 %v164_v10  ;;  %v289_v16 = vunpack.c.h.bf16 %v164_v10  ;;  %v128_v17 = vld [vmem:[#allocation2 + $0xc0] sm:$0xff]  ;;  %306 = vmatpush.msra.mxu2 %v228_v6  ;;  %v220_v19 = vunpack.c.l.bf16 %v130_v11  ;;  %346 = vmatpush.msrb.mxu0 %v229_v8  ;;  %v221_v21 = vunpack.c.h.bf16 %v130_v11 }
   0xb   :  { %v160_v18 = vld [vmem:[#allocation2 + $0x1c0] sm:$0xff]  ;;  %326 = vmatpush.msra.mxu3 %v292_v7  ;;  %v284_v20 = vunpack.c.l.bf16 %v162_v12  ;;  %366 = vmatpush.msrb.mxu1 %v293_v9  ;;  %v285_v22 = vunpack.c.h.bf16 %v162_v12  ;;  %v126_v23 = vld [vmem:[#allocation2 + $0xb0] sm:$0xff]  ;;  %v216_v25 = vunpack.c.l.bf16 %v128_v17  ;;  %v217_v27 = vunpack.c.h.bf16 %v128_v17 }
   0xc   :  { %v158_v24 = vld [vmem:[#allocation2 + $0x1b0] sm:$0xff]  ;;  %307 = vmatpush.msra.mxu2 %v224_v13  ;;  %v280_v26 = vunpack.c.l.bf16 %v160_v18  ;;  %347 = vmatpush.msrb.mxu0 %v225_v15  ;;  %v281_v28 = vunpack.c.h.bf16 %v160_v18  ;;  %v124_v29 = vld [vmem:[#allocation2 + $0xa0] sm:$0xff]  ;;  %v212_v31 = vunpack.c.l.bf16 %v126_v23  ;;  %v213_v33 = vunpack.c.h.bf16 %v126_v23 }
   0xd   :  { %327 = vmatpush.msra.mxu3 %v288_v14  ;;  %367 = vmatpush.msrb.mxu1 %v289_v16  ;;  %v156_v30 = vld [vmem:[#allocation2 + $0x1a0] sm:$0xff]  ;;  %v276_v32 = vunpack.c.l.bf16 %v158_v24  ;;  %v277_v34 = vunpack.c.h.bf16 %v158_v24  ;;  %v122_v35 = vld [vmem:[#allocation2 + $0x90] sm:$0xff]  ;;  %v208_v37 = vunpack.c.l.bf16 %v124_v29  ;;  %v209_v39 = vunpack.c.h.bf16 %v124_v29 }
   0xe   :  { %308 = vmatpush.msra.mxu2 %v220_v19  ;;  %348 = vmatpush.msrb.mxu0 %v221_v21  ;;  %v154_v36 = vld [vmem:[#allocation2 + $0x190] sm:$0xff]  ;;  %v272_v38 = vunpack.c.l.bf16 %v156_v30  ;;  %v273_v40 = vunpack.c.h.bf16 %v156_v30  ;;  %v120_v41 = vld [vmem:[#allocation2 + $0x80] sm:$0xff]  ;;  %v204_v43 = vunpack.c.l.bf16 %v122_v35  ;;  %v205_v45 = vunpack.c.h.bf16 %v122_v35 }
   0xf   :  { %328 = vmatpush.msra.mxu3 %v284_v20  ;;  %368 = vmatpush.msrb.mxu1 %v285_v22  ;;  %v152_v42 = vld [vmem:[#allocation2 + $0x180] sm:$0xff]  ;;  %v268_v44 = vunpack.c.l.bf16 %v154_v36  ;;  %v269_v46 = vunpack.c.h.bf16 %v154_v36  ;;  %v118_v47 = vld [vmem:[#allocation2 + $0x70] sm:$0xff]  ;;  %v200_v49 = vunpack.c.l.bf16 %v120_v41  ;;  %v201_v51 = vunpack.c.h.bf16 %v120_v41 }
  0x10   :  { %309 = vmatpush.msra.mxu2 %v216_v25  ;;  %349 = vmatpush.msrb.mxu0 %v217_v27  ;;  %v150_v48 = vld [vmem:[#allocation2 + $0x170] sm:$0xff]  ;;  %v264_v50 = vunpack.c.l.bf16 %v152_v42  ;;  %v265_v52 = vunpack.c.h.bf16 %v152_v42  ;;  %v116_v53 = vld [vmem:[#allocation2 + $0x60] sm:$0xff]  ;;  %v196_v55 = vunpack.c.l.bf16 %v118_v47  ;;  %v197_v57 = vunpack.c.h.bf16 %v118_v47 }
  0x11   :  { %329 = vmatpush.msra.mxu3 %v280_v26  ;;  %369 = vmatpush.msrb.mxu1 %v281_v28  ;;  %v148_v54 = vld [vmem:[#allocation2 + $0x160] sm:$0xff]  ;;  %v260_v56 = vunpack.c.l.bf16 %v150_v48  ;;  %v261_v58 = vunpack.c.h.bf16 %v150_v48  ;;  %v114_v59 = vld [vmem:[#allocation2 + $0x50] sm:$0xff]  ;;  %v192_v61 = vunpack.c.l.bf16 %v116_v53  ;;  %v193_v63 = vunpack.c.h.bf16 %v116_v53 }
  0x12   :  { %310 = vmatpush.msra.mxu2 %v212_v31  ;;  %350 = vmatpush.msrb.mxu0 %v213_v33  ;;  %v146_v60 = vld [vmem:[#allocation2 + $0x150] sm:$0xff]  ;;  %v256_v62 = vunpack.c.l.bf16 %v148_v54  ;;  %v257_v0 = vunpack.c.h.bf16 %v148_v54  ;;  %v112_v1 = vld [vmem:[#allocation2 + $0x40] sm:$0xff]  ;;  %v188_v3 = vunpack.c.l.bf16 %v114_v59  ;;  %v189_v5 = vunpack.c.h.bf16 %v114_v59  ;;  %v135_v31 = vld [vmem:[#allocation2 + $0xf8] sm:$0xff] }
  0x13   :  { %330 = vmatpush.msra.mxu3 %v276_v32  ;;  %370 = vmatpush.msrb.mxu1 %v277_v34  ;;  %v144_v2 = vld [vmem:[#allocation2 + $0x140] sm:$0xff]  ;;  %v252_v4 = vunpack.c.l.bf16 %v146_v60  ;;  %v253_v6 = vunpack.c.h.bf16 %v146_v60  ;;  %v110_v7 = vld [vmem:[#allocation2 + $0x30] sm:$0xff]  ;;  %v184_v9 = vunpack.c.l.bf16 %v112_v1  ;;  %v185_v11 = vunpack.c.h.bf16 %v112_v1  ;;  %v167_v32 = vld [vmem:[#allocation2 + $0x1f8] sm:$0xff] }
  0x14   :  { %311 = vmatpush.msra.mxu2 %v208_v37  ;;  %351 = vmatpush.msrb.mxu0 %v209_v39  ;;  %v142_v8 = vld [vmem:[#allocation2 + $0x130] sm:$0xff]  ;;  %v248_v10 = vunpack.c.l.bf16 %v144_v2  ;;  %v249_v12 = vunpack.c.h.bf16 %v144_v2  ;;  %v108_v13 = vld [vmem:[#allocation2 + $0x20] sm:$0xff]  ;;  %v180_v15 = vunpack.c.l.bf16 %v110_v7  ;;  %v181_v17 = vunpack.c.h.bf16 %v110_v7  ;;  %v133_v37 = vld [vmem:[#allocation2 + $0xe8] sm:$0xff] }
  0x15   :  { %331 = vmatpush.msra.mxu3 %v272_v38  ;;  %371 = vmatpush.msrb.mxu1 %v273_v40  ;;  %v140_v14 = vld [vmem:[#allocation2 + $0x120] sm:$0xff]  ;;  %v244_v16 = vunpack.c.l.bf16 %v142_v8  ;;  %v245_v18 = vunpack.c.h.bf16 %v142_v8  ;;  %v106_v19 = vld [vmem:[#allocation2 + $0x10] sm:$0xff]  ;;  %v176_v21 = vunpack.c.l.bf16 %v108_v13  ;;  %v177_v23 = vunpack.c.h.bf16 %v108_v13  ;;  %v165_v38 = vld [vmem:[#allocation2 + $0x1e8] sm:$0xff] }
  0x16   :  { %312 = vmatpush.msra.mxu2 %v204_v43  ;;  %352 = vmatpush.msrb.mxu0 %v205_v45  ;;  %v138_v20 = vld [vmem:[#allocation2 + $0x110] sm:$0xff]  ;;  %v240_v22 = vunpack.c.l.bf16 %v140_v14  ;;  %v241_v24 = vunpack.c.h.bf16 %v140_v14  ;;  %v104_v25 = vld [vmem:[#allocation2] sm:$0xff]  ;;  %v172_v27 = vunpack.c.l.bf16 %v106_v19  ;;  %v173_v29 = vunpack.c.h.bf16 %v106_v19  ;;  %v131_v43 = vld [vmem:[#allocation2 + $0xd8] sm:$0xff] }
  0x17   :  { %332 = vmatpush.msra.mxu3 %v268_v44  ;;  %372 = vmatpush.msrb.mxu1 %v269_v46  ;;  %v136_v26 = vld [vmem:[#allocation2 + $0x100] sm:$0xff]  ;;  %v236_v28 = vunpack.c.l.bf16 %v138_v20  ;;  %v237_v30 = vunpack.c.h.bf16 %v138_v20  ;;  %v168_v33 = vunpack.c.l.bf16 %v104_v25  ;;  %v169_v35 = vunpack.c.h.bf16 %v104_v25  ;;  %v163_v44 = vld [vmem:[#allocation2 + $0x1d8] sm:$0xff]  ;;  %v117_v25 = vld [vmem:[#allocation2 + $0x68] sm:$0xff] }
  0x18   :  { %313 = vmatpush.msra.mxu2 %v200_v49  ;;  %353 = vmatpush.msrb.mxu0 %v201_v51  ;;  %v232_v34 = vunpack.c.l.bf16 %v136_v26  ;;  %v233_v36 = vunpack.c.h.bf16 %v136_v26  ;;  %v230_v39 = vunpack.c.l.bf16 %v135_v31  ;;  %v294_v40 = vunpack.c.l.bf16 %v167_v32  ;;  %v129_v49 = vld [vmem:[#allocation2 + $0xc8] sm:$0xff] }
  0x19   :  { %333 = vmatpush.msra.mxu3 %v264_v50  ;;  %373 = vmatpush.msrb.mxu1 %v265_v52  ;;  %v231_v41 = vunpack.c.h.bf16 %v135_v31  ;;  %v295_v42 = vunpack.c.h.bf16 %v167_v32  ;;  %v226_v45 = vunpack.c.l.bf16 %v133_v37  ;;  %v290_v46 = vunpack.c.l.bf16 %v165_v38  ;;  %v161_v50 = vld [vmem:[#allocation2 + $0x1c8] sm:$0xff]  ;;  %v115_v31 = vld [vmem:[#allocation2 + $0x58] sm:$0xff] }
  0x1a   :  { %314 = vmatpush.msra.mxu2 %v196_v55  ;;  %354 = vmatpush.msrb.mxu0 %v197_v57  ;;  %v227_v47 = vunpack.c.h.bf16 %v133_v37  ;;  %v291_v48 = vunpack.c.h.bf16 %v165_v38  ;;  %v222_v51 = vunpack.c.l.bf16 %v131_v43  ;;  %v286_v52 = vunpack.c.l.bf16 %v163_v44  ;;  %v127_v55 = vld [vmem:[#allocation2 + $0xb8] sm:$0xff]  ;;  %v149_v26 = vld [vmem:[#allocation2 + $0x168] sm:$0xff] }
  0x1b   :  { %334 = vmatpush.msra.mxu3 %v260_v56  ;;  %374 = vmatpush.msrb.mxu1 %v261_v58  ;;  %v223_v53 = vunpack.c.h.bf16 %v131_v43  ;;  %v287_v54 = vunpack.c.h.bf16 %v163_v44  ;;  %v159_v56 = vld [vmem:[#allocation2 + $0x1b8] sm:$0xff]  ;;  %v218_v57 = vunpack.c.l.bf16 %v129_v49  ;;  %v282_v58 = vunpack.c.l.bf16 %v161_v50  ;;  %v113_v37 = vld [vmem:[#allocation2 + $0x48] sm:$0xff] }
  0x1c   :  { %315 = vmatpush.msra.mxu2 %v192_v61  ;;  %355 = vmatpush.msrb.mxu0 %v193_v63  ;;  %v219_v59 = vunpack.c.h.bf16 %v129_v49  ;;  %v283_v60 = vunpack.c.h.bf16 %v161_v50  ;;  %v125_v61 = vld [vmem:[#allocation2 + $0xa8] sm:$0xff]  ;;  %v214_v63 = vunpack.c.l.bf16 %v127_v55  ;;  %v215_v1 = vunpack.c.h.bf16 %v127_v55  ;;  %v147_v32 = vld [vmem:[#allocation2 + $0x158] sm:$0xff] }
  0x1d   :  { %335 = vmatpush.msra.mxu3 %v256_v62  ;;  %375 = vmatpush.msrb.mxu1 %v257_v0  ;;  %v157_v62 = vld [vmem:[#allocation2 + $0x1a8] sm:$0xff]  ;;  %v278_v0 = vunpack.c.l.bf16 %v159_v56  ;;  %v279_v2 = vunpack.c.h.bf16 %v159_v56  ;;  %v211_v7 = vunpack.c.h.bf16 %v125_v61  ;;  %v111_v43 = vld [vmem:[#allocation2 + $0x38] sm:$0xff] }
  0x1e   :  { %316 = vmatpush.msra.mxu2 %v188_v3  ;;  %356 = vmatpush.msrb.mxu0 %v189_v5  ;;  %v123_v3 = vld [vmem:[#allocation2 + $0x98] sm:$0xff]  ;;  %v210_v5 = vunpack.c.l.bf16 %v125_v61  ;;  %v275_v8 = vunpack.c.h.bf16 %v157_v62  ;;  %v145_v38 = vld [vmem:[#allocation2 + $0x148] sm:$0xff] }
  0x1f   :  { %336 = vmatpush.msra.mxu3 %v252_v4  ;;  %376 = vmatpush.msrb.mxu1 %v253_v6  ;;  %v155_v4 = vld [vmem:[#allocation2 + $0x198] sm:$0xff]  ;;  %v274_v6 = vunpack.c.l.bf16 %v157_v62  ;;  %v207_v13 = vunpack.c.h.bf16 %v123_v3  ;;  %v109_v49 = vld [vmem:[#allocation2 + $0x28] sm:$0xff] }
  0x20   :  { %317 = vmatpush.msra.mxu2 %v184_v9  ;;  %357 = vmatpush.msrb.mxu0 %v185_v11  ;;  %v121_v9 = vld [vmem:[#allocation2 + $0x88] sm:$0xff]  ;;  %v206_v11 = vunpack.c.l.bf16 %v123_v3  ;;  %v271_v14 = vunpack.c.h.bf16 %v155_v4  ;;  %v143_v44 = vld [vmem:[#allocation2 + $0x138] sm:$0xff]  ;;  %v52_v3 = vld [vmem:[%s1213_s2] sm:$0x3] }
  0x21   :  { %337 = vmatpush.msra.mxu3 %v248_v10  ;;  %377 = vmatpush.msrb.mxu1 %v249_v12  ;;  %v153_v10 = vld [vmem:[#allocation2 + $0x188] sm:$0xff]  ;;  %v270_v12 = vunpack.c.l.bf16 %v155_v4  ;;  %v203_v19 = vunpack.c.h.bf16 %v121_v9  ;;  %v139_v56 = vld [vmem:[#allocation2 + $0x118] sm:$0xff]  ;;  %v54_v4 = vperm.slane %v52_v3, 0 }
  0x22   :  { %318 = vmatpush.msra.mxu2 %v180_v15  ;;  %358 = vmatpush.msrb.mxu0 %v181_v17  ;;  %v119_v15 = vld [vmem:[#allocation2 + $0x78] sm:$0xff]  ;;  %v202_v17 = vunpack.c.l.bf16 %v121_v9  ;;  %v267_v20 = vunpack.c.h.bf16 %v153_v10  ;;  %v141_v50 = vld [vmem:[#allocation2 + $0x128] sm:$0xff]  ;;  %v238_v61 = vunpack.c.l.bf16 %v139_v56  ;;  %v239_v62 = vunpack.c.h.bf16 %v139_v56 }
  0x23   :  { %338 = vmatpush.msra.mxu3 %v244_v16  ;;  %378 = vmatpush.msrb.mxu1 %v245_v18  ;;  %v151_v16 = vld [vmem:[#allocation2 + $0x178] sm:$0xff]  ;;  %v266_v18 = vunpack.c.l.bf16 %v153_v10  ;;  %v243_v55 = vunpack.c.h.bf16 %v141_v50 }
  0x24   :  { %319 = vmatpush.msra.mxu2 %v176_v21  ;;  %359 = vmatpush.msrb.mxu0 %v177_v23  ;;  %v198_v21 = vunpack.c.l.bf16 %v119_v15  ;;  %v199_v23 = vunpack.c.h.bf16 %v119_v15  ;;  %v917_v9 = vld [vmem:[%s1216_s5 + $0x38] sm:$0xff]  }
  0x25   :  { %339 = vmatpush.msra.mxu3 %v240_v22  ;;  %379 = vmatpush.msrb.mxu1 %v241_v24  ;;  %v262_v22 = vunpack.c.l.bf16 %v151_v16  ;;  %v263_v24 = vunpack.c.h.bf16 %v151_v16 }
  0x26   :  { %320 = vmatpush.msra.mxu2 %v172_v27  ;;  %360 = vmatpush.msrb.mxu0 %v173_v29  ;;  %v194_v27 = vunpack.c.l.bf16 %v117_v25  ;;  %v258_v29 = vunpack.c.l.bf16 %v149_v26 }
  0x27   :  { %340 = vmatpush.msra.mxu3 %v236_v28  ;;  %380 = vmatpush.msrb.mxu1 %v237_v30  ;;  %v195_v28 = vunpack.c.h.bf16 %v117_v25  ;;  %v259_v30 = vunpack.c.h.bf16 %v149_v26  ;;  %v932_v25 = vld [vmem:[%s1216_s5 + $0xb0] sm:$0xff]  }
  0x28   :  { %321 = vmatpush.msra.mxu2 %v168_v33  ;;  %361 = vmatpush.msrb.mxu0 %v169_v35  ;;  %v190_v33 = vunpack.c.l.bf16 %v115_v31  ;;  %v254_v35 = vunpack.c.l.bf16 %v147_v32 }
  0x29   :  { %341 = vmatpush.msra.mxu3 %v232_v34  ;;  %381 = vmatpush.msrb.mxu1 %v233_v36  ;;  %v191_v34 = vunpack.c.h.bf16 %v115_v31  ;;  %v255_v36 = vunpack.c.h.bf16 %v147_v32  ;;  %v874_v31 = vunpack.c.h.bf16 %v932_v25  ;;  %v923_v32 = vld [vmem:[%s1216_s5 + $0x68] sm:$0xff]  }
  0x2a   :  { %386 = vmatpush.msrb.mxu2 %v230_v39  ;;  %426 = vmatpush.msra.mxu0 %v231_v41  ;;  %v186_v39 = vunpack.c.l.bf16 %v113_v37  ;;  %v250_v41 = vunpack.c.l.bf16 %v145_v38 }
  0x2b   :  { %406 = vmatpush.msrb.mxu3 %v294_v40  ;;  %446 = vmatpush.msra.mxu1 %v295_v42  ;;  %v187_v40 = vunpack.c.h.bf16 %v113_v37  ;;  %v251_v42 = vunpack.c.h.bf16 %v145_v38  ;;  %v1108_v37 = vld [vmem:[%s1216_s5 + $0xa8] sm:$0xff]  }
  0x2c   :  { %387 = vmatpush.msrb.mxu2 %v226_v45  ;;  %427 = vmatpush.msra.mxu0 %v227_v47  ;;  %v182_v45 = vunpack.c.l.bf16 %v111_v43  ;;  %v246_v47 = vunpack.c.l.bf16 %v143_v44 }
  0x2d   :  { %407 = vmatpush.msrb.mxu3 %v290_v46  ;;  %447 = vmatpush.msra.mxu1 %v291_v48  ;;  %v183_v46 = vunpack.c.h.bf16 %v111_v43  ;;  %v247_v48 = vunpack.c.h.bf16 %v143_v44  ;;  %v914_v44 = vld [vmem:[%s1216_s5 + $0x20] sm:$0xff]  }
  0x2e   :  { %388 = vmatpush.msrb.mxu2 %v222_v51  ;;  %428 = vmatpush.msra.mxu0 %v223_v53  ;;  %v107_v51 = vld [vmem:[#allocation2 + $0x18] sm:$0xff]  ;;  %v179_v53 = vunpack.c.h.bf16 %v109_v49  ;;  %v801_v56 = vunpack.c.l.bf16 %v914_v44 }
  0x2f   :  { %408 = vmatpush.msrb.mxu3 %v286_v52  ;;  %448 = vmatpush.msra.mxu1 %v287_v54  ;;  %v178_v52 = vunpack.c.l.bf16 %v109_v49  ;;  %v242_v54 = vunpack.c.l.bf16 %v141_v50 }
  0x30   :  { %389 = vmatpush.msrb.mxu2 %v218_v57  ;;  %429 = vmatpush.msra.mxu0 %v219_v59  ;;  %v105_v57 = vld [vmem:[#allocation2 + $0x8] sm:$0xff]  ;;  %v174_v59 = vunpack.c.l.bf16 %v107_v51 }
  0x31   :  { %409 = vmatpush.msrb.mxu3 %v282_v58  ;;  %449 = vmatpush.msra.mxu1 %v283_v60  ;;  %v137_v58 = vld [vmem:[#allocation2 + $0x108] sm:$0xff]  ;;  %v175_v60 = vunpack.c.h.bf16 %v107_v51  ;;  %v802_v51 = vunpack.c.h.bf16 %v914_v44  ;;  %v296_v44 = vld [vmem:[%s1215_s4] sm:$0xf] }
  0x32   :  { %390 = vmatpush.msrb.mxu2 %v214_v63  ;;  %430 = vmatpush.msra.mxu0 %v215_v1  ;;  %v170_v63 = vunpack.c.l.bf16 %v105_v57  ;;  %v171_v1 = vunpack.c.h.bf16 %v105_v57 }
  0x33   :  { %410 = vmatpush.msrb.mxu3 %v278_v0  ;;  %450 = vmatpush.msra.mxu1 %v279_v2  ;;  %v234_v0 = vunpack.c.l.bf16 %v137_v58  ;;  %v235_v2 = vunpack.c.h.bf16 %v137_v58 }
  0x34   :  { %391 = vmatpush.msrb.mxu2 %v210_v5  ;;  %431 = vmatpush.msra.mxu0 %v211_v7  ;;  %v55_v5 = vperm.slane %v52_v3, 1 }
  0x35   :  { %411 = vmatpush.msrb.mxu3 %v274_v6  ;;  %451 = vmatpush.msra.mxu1 %v275_v8  ;;  %v925_v8 = vld [vmem:[%s1216_s5 + $0x78] sm:$0xff]  }
  0x36   :  { %392 = vmatpush.msrb.mxu2 %v206_v11  ;;  %432 = vmatpush.msra.mxu0 %v207_v13  ;;  %v933_v13 = vld [vmem:[%s1216_s5 + $0xb8] sm:$0xff]   ;;  %v846_v16 = vunpack.c.h.bf16 %v925_v8 }
  0x37   :  { %412 = vmatpush.msrb.mxu3 %v270_v12  ;;  %452 = vmatpush.msra.mxu1 %v271_v14  ;;  %v941_v12 = vld [vmem:[%s1216_s5 + $0xf8] sm:$0xff]  }
  0x38   :  { %393 = vmatpush.msrb.mxu2 %v202_v17  ;;  %433 = vmatpush.msra.mxu0 %v203_v19  ;;  %v814_v17 = vunpack.c.h.bf16 %v917_v9  ;;  %v910_v19 = vunpack.c.h.bf16 %v941_v12  ;;  %v909_v26 = vunpack.c.l.bf16 %v941_v12  ;;  %v918_v12 = vld [vmem:[%s1216_s5 + $0x40] sm:$0xff]  }
  0x39   :  { %413 = vmatpush.msrb.mxu3 %v266_v18  ;;  %453 = vmatpush.msra.mxu1 %v267_v20  ;;  %v924_v18 = vld [vmem:[%s1216_s5 + $0x70] sm:$0xff]  }
  0x3a   :  { %394 = vmatpush.msrb.mxu2 %v198_v21  ;;  %434 = vmatpush.msra.mxu0 %v199_v23  ;;  %v916_v20 = vld [vmem:[%s1216_s5 + $0x30] sm:$0xff]   ;;  %v878_v21 = vunpack.c.h.bf16 %v933_v13  ;;  %v813_v23 = vunpack.c.l.bf16 %v917_v9 }
  0x3b   :  { %414 = vmatpush.msrb.mxu3 %v262_v22  ;;  %454 = vmatpush.msra.mxu1 %v263_v24  ;;  %v845_v22 = vunpack.c.l.bf16 %v925_v8  ;;  %v940_v24 = vld [vmem:[%s1216_s5 + $0xf0] sm:$0xff]  }
  0x3c   :  { %395 = vmatpush.msrb.mxu2 %v194_v27  ;;  %435 = vmatpush.msra.mxu0 %v195_v28  ;;  %v877_v27 = vunpack.c.l.bf16 %v933_v13  ;;  %v842_v28 = vunpack.c.h.bf16 %v924_v18  ;;  %v905_v38 = vunpack.c.l.bf16 %v940_v24  ;;  %v936_v13 = vld [vmem:[%s1216_s5 + $0xd0] sm:$0xff]  }
  0x3d   :  { %415 = vmatpush.msrb.mxu3 %v258_v29  ;;  %455 = vmatpush.msra.mxu1 %v259_v30  ;;  %v810_v29 = vunpack.c.h.bf16 %v916_v20  ;;  %v906_v30 = vunpack.c.h.bf16 %v940_v24  ;;  %v935_v24 = vld [vmem:[%s1216_s5 + $0xc8] sm:$0xff]  }
  0x3e   :  { %396 = vmatpush.msrb.mxu2 %v190_v33  ;;  %436 = vmatpush.msra.mxu0 %v191_v34  ;;  %v915_v33 = vld [vmem:[%s1216_s5 + $0x28] sm:$0xff]   ;;  %v841_v34 = vunpack.c.l.bf16 %v924_v18 }
  0x3f   :  { %416 = vmatpush.msrb.mxu3 %v254_v35  ;;  %456 = vmatpush.msra.mxu1 %v255_v36  ;;  %v809_v35 = vunpack.c.l.bf16 %v916_v20  ;;  %v939_v36 = vld [vmem:[%s1216_s5 + $0xe8] sm:$0xff]  }
  0x40   :  { %397 = vmatpush.msrb.mxu2 %v186_v39  ;;  %437 = vmatpush.msra.mxu0 %v187_v40  ;;  %v873_v39 = vunpack.c.l.bf16 %v932_v25  ;;  %v838_v40 = vunpack.c.h.bf16 %v923_v32  ;;  %v902_v43 = vunpack.c.h.bf16 %v939_v36  ;;  %v901_v49 = vunpack.c.l.bf16 %v939_v36  ;;  %v911_v18 = vld [vmem:[%s1216_s5 + $0x8] sm:$0xff]  }
  0x41   :  { %417 = vmatpush.msrb.mxu3 %v250_v41  ;;  %457 = vmatpush.msra.mxu1 %v251_v42  ;;  %v806_v41 = vunpack.c.h.bf16 %v915_v33  ;;  %v922_v42 = vld [vmem:[%s1216_s5 + $0x60] sm:$0xff]   ;;  %v790_v20 = vunpack.c.h.bf16 %v911_v18  ;;  %v789_v25 = vunpack.c.l.bf16 %v911_v18 }
  0x42   :  { %398 = vmatpush.msrb.mxu2 %v182_v45  ;;  %438 = vmatpush.msra.mxu0 %v183_v46  ;;  %v870_v45 = vunpack.c.h.bf16 %v1108_v37  ;;  %v837_v46 = vunpack.c.l.bf16 %v923_v32  ;;  %v834_v50 = vunpack.c.h.bf16 %v922_v42  ;;  %v885_v32 = vunpack.c.l.bf16 %v935_v24 }
  0x43   :  { %418 = vmatpush.msrb.mxu3 %v246_v47  ;;  %458 = vmatpush.msra.mxu1 %v247_v48  ;;  %v805_v47 = vunpack.c.l.bf16 %v915_v33  ;;  %v938_v48 = vld [vmem:[%s1216_s5 + $0xe0] sm:$0xff]  }
  0x44   :  { %399 = vmatpush.msrb.mxu2 %v178_v52  ;;  %439 = vmatpush.msra.mxu0 %v179_v53  ;;  %v921_v52 = vld [vmem:[%s1216_s5 + $0x58] sm:$0xff]   ;;  %v898_v53 = vunpack.c.h.bf16 %v938_v48  ;;  %v897_v57 = vunpack.c.l.bf16 %v938_v48  ;;  %v934_v33 = vld [vmem:[%s1216_s5 + $0xc0] sm:$0xff]  }
  0x45   :  { %419 = vmatpush.msrb.mxu3 %v242_v54  ;;  %459 = vmatpush.msra.mxu1 %v243_v55  ;;  %v913_v54 = vld [vmem:[%s1216_s5 + $0x18] sm:$0xff]   ;;  %v833_v55 = vunpack.c.l.bf16 %v922_v42  ;;  %v830_v58 = vunpack.c.h.bf16 %v921_v52  ;;  %v882_v36 = vunpack.c.h.bf16 %v934_v33 }
  0x46   :  { %400 = vmatpush.msrb.mxu2 %v174_v59  ;;  %440 = vmatpush.msra.mxu0 %v175_v60  ;;  %v798_v59 = vunpack.c.h.bf16 %v913_v54  ;;  %v920_v60 = vld [vmem:[%s1216_s5 + $0x50] sm:$0xff]  }
  0x47   :  { %420 = vmatpush.msrb.mxu3 %v238_v61  ;;  %460 = vmatpush.msra.mxu1 %v239_v62  ;;  %v829_v61 = vunpack.c.l.bf16 %v921_v52  ;;  %v826_v62 = vunpack.c.h.bf16 %v920_v60 }
  0x48   :  { %401 = vmatpush.msrb.mxu2 %v170_v63  ;;  %441 = vmatpush.msra.mxu0 %v171_v1  ;;  %v825_v63 = vunpack.c.l.bf16 %v920_v60  ;;  %v937_v1 = vld [vmem:[%s1216_s5 + $0xd8] sm:$0xff]  }
  0x49   :  { %421 = vmatpush.msrb.mxu3 %v234_v0  ;;  %461 = vmatpush.msra.mxu1 %v235_v2  ;;  %v919_v0 = vld [vmem:[%s1216_s5 + $0x48] sm:$0xff]   ;;  %v797_v2 = vunpack.c.l.bf16 %v913_v54  ;;  %v301_v54 = vperm.slane %v296_v44, 3 }
  0x4a   :  { %v822_v3 = vunpack.c.h.bf16 %v919_v0  ;;  %v821_v9 = vunpack.c.l.bf16 %v919_v0 }
  0x85   :  { %v79_v6 = vpop.f32.mrf.mxu0  ;;  %v99_v7 = vpop.f32.mrf.mxu1 }
  0x86   :  { %v80_v10 = vadd.f32 %v79_v6, %v54_v4  ;;  %v100_v11 = vadd.f32 %v99_v7, %v55_v5  ;;  %v869_v4 = vunpack.c.l.bf16 %v1108_v37  ;;  %v894_v5 = vunpack.c.h.bf16 %v937_v1  ;;  %v912_v6 = vld [vmem:[%s1216_s5 + $0x10] sm:$0xff]   ;;  %v930_v7 = vld [vmem:[%s1216_s5 + $0xa0] sm:$0xff]   ;;  %v927_v37 = vld [vmem:[%s1216_s5 + $0x88] sm:$0xff]  }
  0x87   :  { %v794_v8 = vunpack.c.h.bf16 %v912_v6 }
  0x88   :  { %v102_v14 = vmax.f32 %v80_v10, 0.0  ;;  %v103_v15 = vmax.f32 %v100_v11, 0.0  ;;  %v866_v10 = vunpack.c.h.bf16 %v930_v7  ;;  %v893_v11 = vunpack.c.l.bf16 %v937_v1 }
  0x8a   :  { %322 = vmatmul.f32.vlgmr.msra.gmra.mxu2 %v102_v14  ;;  %342 = vmatmul.f32.vlgmr.msra.gmra.mxu3 %v103_v15 }
  0x8b   :  { %362 = vmatmul.f32.vlgmr.msrb.gmra.mxu0 %v102_v14  ;;  %382 = vmatmul.f32.vlgmr.msrb.gmra.mxu1 %v103_v15 }
  0x8c   :  { %622 = vmatpush.msra.mxu3 %v846_v16  ;;  %602 = vmatpush.msra.mxu2 %v814_v17  ;;  %v865_v16 = vunpack.c.l.bf16 %v930_v7  ;;  %v890_v17 = vunpack.c.h.bf16 %v936_v13  ;;  %v684_v7 = vld [vmem:[%s1218_s7 + $0x10] sm:$0xff] }
  0x8d   :  { %662 = vmatpush.msrb.mxu1 %v910_v19  ;;  %642 = vmatpush.msrb.mxu0 %v878_v21  ;;  %v929_v19 = vld [vmem:[%s1216_s5 + $0x98] sm:$0xff]   ;;  %v817_v21 = vunpack.c.l.bf16 %v918_v12 }
  0x8e   :  { %623 = vmatpush.msra.mxu3 %v845_v22  ;;  %603 = vmatpush.msra.mxu2 %v813_v23  ;;  %v862_v22 = vunpack.c.h.bf16 %v929_v19  ;;  %v889_v23 = vunpack.c.l.bf16 %v936_v13 }
  0x8f   :  { %663 = vmatpush.msrb.mxu1 %v909_v26  ;;  %643 = vmatpush.msrb.mxu0 %v877_v27  ;;  %v861_v26 = vunpack.c.l.bf16 %v929_v19  ;;  %v886_v27 = vunpack.c.h.bf16 %v935_v24  ;;  %v718_v24 = vld [vmem:[%s1219_s8] sm:$0xff] }
  0x90   :  { %624 = vmatpush.msra.mxu3 %v842_v28  ;;  %604 = vmatpush.msra.mxu2 %v810_v29  ;;  %v784_v28 = vld [vmem:[%s1216_s5] sm:$0xff]   ;;  %v928_v29 = vld [vmem:[%s1216_s5 + $0x90] sm:$0xff]  }
  0x91   :  { %664 = vmatpush.msrb.mxu1 %v906_v30  ;;  %644 = vmatpush.msrb.mxu0 %v874_v31  ;;  %v786_v30 = vunpack.c.h.bf16 %v784_v28  ;;  %v858_v31 = vunpack.c.h.bf16 %v928_v29 }
  0x92   :  { %402 = vmatmul.f32.vlgmr.msrb.gmra.mxu2 %v102_v14  ;;  %422 = vmatmul.f32.vlgmr.msrb.gmra.mxu3 %v103_v15 }
  0x93   :  { %442 = vmatmul.f32.vlgmr.msra.gmra.mxu0 %v102_v14  ;;  %462 = vmatmul.f32.vlgmr.msra.gmra.mxu1 %v103_v15  ;;  %v793_v14 = vunpack.c.l.bf16 %v912_v6  ;;  %v818_v15 = vunpack.c.h.bf16 %v918_v12  ;;  %v685_v6 = vld [vmem:[%s1218_s7 + $0x18] sm:$0xff] }
  0x94   :  { %625 = vmatpush.msra.mxu3 %v841_v34  ;;  %605 = vmatpush.msra.mxu2 %v809_v35  ;;  %v785_v34 = vunpack.c.l.bf16 %v784_v28  ;;  %v857_v35 = vunpack.c.l.bf16 %v928_v29 }
  0x95   :  { %665 = vmatpush.msrb.mxu1 %v905_v38  ;;  %645 = vmatpush.msrb.mxu0 %v873_v39  ;;  %v854_v38 = vunpack.c.h.bf16 %v927_v37  ;;  %v881_v39 = vunpack.c.l.bf16 %v934_v33 }
  0x96   :  { %626 = vmatpush.msra.mxu3 %v838_v40  ;;  %606 = vmatpush.msra.mxu2 %v806_v41  ;;  %v853_v40 = vunpack.c.l.bf16 %v927_v37  ;;  %v926_v41 = vld [vmem:[%s1216_s5 + $0x80] sm:$0xff]  }
  0x97   :  { %666 = vmatpush.msrb.mxu1 %v902_v43  ;;  %646 = vmatpush.msrb.mxu0 %v870_v45  ;;  %v850_v42 = vunpack.c.h.bf16 %v926_v41  ;;  %v849_v43 = vunpack.c.l.bf16 %v926_v41  ;;  %v299_v45 = vperm.slane %v296_v44, 1 }
  0x98   :  { %627 = vmatpush.msra.mxu3 %v837_v46  ;;  %607 = vmatpush.msra.mxu2 %v805_v47 }
  0x99   :  { %667 = vmatpush.msrb.mxu1 %v901_v49  ;;  %647 = vmatpush.msrb.mxu0 %v869_v4  ;;  %v298_v49 = vperm.slane %v296_v44, 0 }
  0x9a   :  { %628 = vmatpush.msra.mxu3 %v834_v50  ;;  %608 = vmatpush.msra.mxu2 %v802_v51 }
  0x9b   :  { %668 = vmatpush.msrb.mxu1 %v898_v53  ;;  %648 = vmatpush.msrb.mxu0 %v866_v10  ;;  %v946_v10 = vld [vmem:[%s1217_s6] ss:$0 sm:$0xff] }
  0x9c   :  { %629 = vmatpush.msra.mxu3 %v833_v55  ;;  %609 = vmatpush.msra.mxu2 %v801_v56 }
  0x9d   :  { %669 = vmatpush.msrb.mxu1 %v897_v57  ;;  %649 = vmatpush.msrb.mxu0 %v865_v16 }
  0x9e   :  { %630 = vmatpush.msra.mxu3 %v830_v58  ;;  %610 = vmatpush.msra.mxu2 %v798_v59 }
  0x9f   :  { %670 = vmatpush.msrb.mxu1 %v894_v5  ;;  %650 = vmatpush.msrb.mxu0 %v862_v22  ;;  %v686_v5 = vld [vmem:[%s1218_s7 + $0x20] sm:$0xff]  ;;  %v720_v22 = vld [vmem:[%s1219_s8 + $0x10] sm:$0xff] }
  0xa0   :  { %631 = vmatpush.msra.mxu3 %v829_v61  ;;  %611 = vmatpush.msra.mxu2 %v797_v2  ;;  %v300_v61 = vperm.slane %v296_v44, 2 }
  0xa1   :  { %671 = vmatpush.msrb.mxu1 %v893_v11  ;;  %651 = vmatpush.msrb.mxu0 %v861_v26 }
  0xa2   :  { %632 = vmatpush.msra.mxu3 %v826_v62  ;;  %612 = vmatpush.msra.mxu2 %v794_v8  ;;  %v683_v8 = vld [vmem:[%s1218_s7 + $0x8] sm:$0xff] }
  0xa3   :  { %672 = vmatpush.msrb.mxu1 %v890_v17  ;;  %652 = vmatpush.msrb.mxu0 %v858_v31 }
  0xa4   :  { %633 = vmatpush.msra.mxu3 %v825_v63  ;;  %613 = vmatpush.msra.mxu2 %v793_v14 }
  0xa5   :  { %673 = vmatpush.msrb.mxu1 %v889_v23  ;;  %653 = vmatpush.msrb.mxu0 %v857_v35  ;;  %v719_v23 = vld [vmem:[%s1219_s8 + $0x8] sm:$0xff] }
  0xa6   :  { %634 = vmatpush.msra.mxu3 %v822_v3  ;;  %614 = vmatpush.msra.mxu2 %v790_v20 }
  0xa7   :  { %674 = vmatpush.msrb.mxu1 %v886_v27  ;;  %654 = vmatpush.msrb.mxu0 %v854_v38 }
  0xa8   :  { %635 = vmatpush.msra.mxu3 %v821_v9  ;;  %615 = vmatpush.msra.mxu2 %v789_v25  ;;  %v682_v9 = vld [vmem:[%s1218_s7] sm:$0xff] }
  0xa9   :  { %675 = vmatpush.msrb.mxu1 %v885_v32  ;;  %655 = vmatpush.msrb.mxu0 %v853_v40 }
  0xaa   :  { %636 = vmatpush.msra.mxu3 %v818_v15  ;;  %616 = vmatpush.msra.mxu2 %v786_v30 }
  0xab   :  { %676 = vmatpush.msrb.mxu1 %v882_v36  ;;  %656 = vmatpush.msrb.mxu0 %v850_v42 }
  0xac   :  { %637 = vmatpush.msra.mxu3 %v817_v21  ;;  %617 = vmatpush.msra.mxu2 %v785_v34  ;;  %v721_v21 = vld [vmem:[%s1219_s8 + $0x18] sm:$0xff]  ;;  %s1006_s8 = smov [#allocation5]  }
  0xad   :  { %677 = vmatpush.msrb.mxu1 %v881_v39  ;;  %657 = vmatpush.msrb.mxu0 %v849_v43  ;;  %s767_s2 = sshll.u32 %s1006_s8, 4  ;;  %s768_s2 = int_to_ptr.vmem [resolvable:$true] %s767_s2 }
  0xae   :  { %702 = vmatpush.msrb.mxu2 %v686_v5  ;;  %737 = vmatpush.msrb.mxu3 %v721_v21 }
  0xb0   :  { %703 = vmatpush.msrb.mxu2 %v685_v6  ;;  %738 = vmatpush.msrb.mxu3 %v720_v22 }
  0xb2   :  { %704 = vmatpush.msrb.mxu2 %v684_v7  ;;  %739 = vmatpush.msrb.mxu3 %v719_v23 }
  0xb4   :  { %705 = vmatpush.msrb.mxu2 %v683_v8  ;;  %740 = vmatpush.msrb.mxu3 %v718_v24 }
  0xb6   :  { %706 = vmatpush.msrb.mxu2 %v682_v9 }
 0x108   :  { %v363_v46 = vpop.f32.mrf.mxu0  ;;  %v383_v47 = vpop.f32.mrf.mxu1 }
 0x109   :  { %v364_v48 = vadd.f32 %v363_v46, %v299_v45 }
 0x10b   :  { %v384_v50 = vadd.f32 %v383_v47, %v364_v48 }
 0x10d   :  { %v467_v51 = vmax.f32 %v384_v50, 0.0  ;;  %v323_v52 = vpop.f32.mrf.mxu2  ;;  %v343_v53 = vpop.f32.mrf.mxu3 }
 0x10e   :  { %v324_v55 = vadd.f32 %v323_v52, %v298_v49 }
 0x10f   :  { %638 = vmatmul.f32.vlgmr.msra.gmra.mxu3 %v467_v51 }
 0x110   :  { %v344_v56 = vadd.f32 %v343_v53, %v324_v55  ;;  %v443_v57 = vpop.f32.mrf.mxu0  ;;  %v463_v60 = vpop.f32.mrf.mxu1 }
 0x111   :  { %v444_v58 = vadd.f32 %v443_v57, %v301_v54 }
 0x112   :  { %v466_v59 = vmax.f32 %v344_v56, 0.0 }
 0x113   :  { %v464_v62 = vadd.f32 %v463_v60, %v444_v58 }
 0x114   :  { %618 = vmatmul.f32.vlgmr.msra.gmra.mxu2 %v466_v59 }
 0x115   :  { %v469_v63 = vmax.f32 %v464_v62, 0.0  ;;  %v403_v0 = vpop.f32.mrf.mxu2  ;;  %v423_v2 = vpop.f32.mrf.mxu3 }
 0x116   :  { %v404_v1 = vadd.f32 %v403_v0, %v300_v61 }
 0x117   :  { %678 = vmatmul.f32.vlgmr.msrb.gmra.mxu1 %v469_v63 }
 0x118   :  { %v424_v3 = vadd.f32 %v423_v2, %v404_v1 }
 0x11a   :  { %v468_v4 = vmax.f32 %v424_v3, 0.0 }
 0x11c   :  { %658 = vmatmul.f32.vlgmr.msrb.gmra.mxu0 %v468_v4 }
 0x192   :  { %v639_v13 = vpop.f32.mrf.mxu3 }
 0x194   :  { %v679_v17 = vpop.f32.mrf.mxu1 }
 0x197   :  { %v619_v11 = vpop.f32.mrf.mxu2 }
 0x198   :  { %v620_v12 = vadd.f32 %v946_v10, %v619_v11 }
 0x199   :  { %v659_v15 = vpop.f32.mrf.mxu0 }
 0x19a   :  { %v640_v14 = vadd.f32 %v639_v13, %v620_v12 }
 0x19c   :  { %v660_v16 = vadd.f32 %v659_v15, %v640_v14 }
 0x19e   :  { %v680_v18 = vadd.f32 %v679_v17, %v660_v16 }
 0x1a0   :  { %781 = vmatmul.msk.f32.vlgmr.msrb.gmra.mxu2 %vm687_vm1, %v680_v18 }
 0x223   :  { %v708_v19 = vpop.f32.mrf.mxu2 }
 0x224   :  { %v712_v20 = vsel %vm711_vm2, %v708_v19, -inf }
 0x225   :  { %713 = vmax.xlane.f32.xlu0 %v712_v20 }
 0x298   :  { %v714_v25 = vpop.xlane.xlu0 %713 }
 0x299   :  { %v715_v26 = vsub.f32 %v708_v19, %v714_v25 }
 0x29b   :  { %v716_v27 = vmul.f32 1.442695, %v715_v26 }
 0x29d   :  { %947 = vpow2.f32 %v716_v27 }
 0x2a3   :  { %v948_v28 = vpop.eup %947 }
 0x2a4   :  { %782 = vmatmul.msk.f32.vlgmr.msrb.gmra.mxu3 %vm711_vm2, %v948_v28 }
 0x327   :  { %v742_v29 = vpop.f32.mrf.mxu3 }
 0x328   :  { %949 = vrcp.f32 %v742_v29  ;;  %v756_v33 = vand.u32 2147483648, %v742_v29  ;;  %v754_v35 = vand.u32 2147483647, %v742_v29  ;;  %vm750_vm4 = vweird.f32 %v742_v29 }
 0x32a   :  { %v757_v37 = vor.u32 1.1754944e-38, %v756_v33  ;;  %vm755_vm6 = vcmp.eq.f32.partialorder %v754_v35, 8.507059e+37 }
 0x32e   :  { %v950_v30 = vpop.eup %949 }
 0x32f   :  { %v746_v31 = vmul.f32 %v950_v30, %v742_v29  ;;  %vm751_vm3 = vweird.f32 %v950_v30 }
 0x330   :  { %vm752_vm5 = vmor %vm750_vm4, %vm751_vm3 }
 0x331   :  { %v747_v32 = vsub.f32 1.0, %v746_v31 }
 0x333   :  { %v748_v34 = vmul.f32 %v950_v30, %v747_v32 }
 0x335   :  { %v749_v36 = vadd.f32 %v950_v30, %v748_v34 }
 0x337   :  { %v753_v38 = vsel %vm752_vm5, %v950_v30, %v749_v36 }
 0x338   :  { %v758_v39 = vsel %vm755_vm6, %v757_v37, %v753_v38 }
 0x339   :  { %v759_v40 = vmul.f32 %v948_v28, %v758_v39 }
 0x33b   :  { %v760_v41 = vmax.f32 %v759_v40, 0.001 }
 0x33d   :  { %761 = vst.msk [vmem:[#allocation5] sm:$0xff] %vm711_vm2, %v760_v41 }
 0x33e   :  { %772 = dma.vmem_to_hbm [thread:$0]  %s768_s2, 128, %s770_s30, [#allocation4]  }
 0x33f   :  { %1001 = dma.done.wait [#allocation4], 128  }
 0x340   :  { %1002 = vsyncadd [#allocation4], 4294967168 }
 0x341   :  { %777 = vsyncpa [#allocation3], 1 }
 0x342   :  { %778 = vsyncpa [#allocation4], 1 }

</bundles_post_ra>
